<compile_context>
chip_gen: v7x
topology: tpu7x:2x2x1
jax: 0.10.0
libtpu: 0.0.40
codegen_flags: <defaults>
</compile_context>

<pallas_src>
import jax
import jax.numpy as jnp
from jax.experimental import pallas as pl
from jax.experimental.pallas import tpu as pltpu

OBS_DIM = 16
HIDDEN = 64
ACTION_DIM = 8
OUT_PAD = 128            # lane-dense padded output width
BATCH = 2
GAMMA = 0.99
USE_TANH = True          # args.method.tanh
TILE_B = 512             # batch tile (multiple of 16 for bf16 sublane packing)


def _round_up(n, m):
    return ((n + m - 1) // m) * m


def softq_kernel(x_ref, w1_ref, b1_ref, w2_ref, b2_ref, w3_ref, b3_ref, o_ref):
    # x / weights arrive in bf16 (MXU inputs); accumulate and do the
    # epilogue (bias, ReLU, tanh, scale) in f32.
    x = x_ref[...]
    h1 = jnp.dot(x, w1_ref[...], preferred_element_type=jnp.float32) + b1_ref[...]
    h1 = jnp.maximum(h1, 0.0)
    h2 = jnp.dot(h1.astype(jnp.bfloat16), w2_ref[...],
                 preferred_element_type=jnp.float32) + b2_ref[...]
    h2 = jnp.maximum(h2, 0.0)
    out = jnp.dot(h2.astype(jnp.bfloat16), w3_ref[...],
                  preferred_element_type=jnp.float32) + b3_ref[...]
    if USE_TANH:
        out = jnp.tanh(out) * (1.0 / (1.0 - GAMMA))
    o_ref[...] = out.astype(o_ref.dtype)


def softq_forward(x, params, tile_b=TILE_B):
    w1, b1, w2, b2, w3, b3 = params
    B = x.shape[0]

    # Pad the last layer to a lane-dense 128-wide output slab (zeros).
    w3p = jnp.zeros((HIDDEN, OUT_PAD), jnp.float32).at[:, :ACTION_DIM].set(w3)
    b3p = jnp.zeros((1, OUT_PAD), jnp.float32).at[:, :ACTION_DIM].set(b3)

    # Pick the batch tile: large for big batches, shrunk (multiple of 16)
    # for small ones; pad the batch up to a whole number of tiles.
    tb = min(tile_b, _round_up(B, 16))
    Bp = _round_up(B, tb)
    if Bp != B:
        x = jnp.pad(x, ((0, Bp - B), (0, 0)))
    grid = (Bp // tb,)

    x_bf16 = x.astype(jnp.bfloat16)
    w1_bf16 = w1.astype(jnp.bfloat16)
    w2_bf16 = w2.astype(jnp.bfloat16)
    w3_bf16 = w3p.astype(jnp.bfloat16)

    flops = 2 * Bp * (OBS_DIM * HIDDEN + HIDDEN * HIDDEN + HIDDEN * OUT_PAD)
    bytes_accessed = (x_bf16.size * 2 + Bp * OUT_PAD * 4
                      + (w1_bf16.size + w2_bf16.size + w3_bf16.size) * 2
                      + (b1.size + b2.size + b3p.size) * 4)
    cost = pl.CostEstimate(flops=flops,
                           transcendentals=Bp * OUT_PAD,
                           bytes_accessed=bytes_accessed)

    in_specs = [
        pl.BlockSpec((tb, OBS_DIM), lambda i: (i, 0)),          # x: batch-tiled
        pl.BlockSpec((OBS_DIM, HIDDEN), lambda i: (0, 0)),      # weights/biases:
        pl.BlockSpec((1, HIDDEN), lambda i: (0, 0)),            #  VMEM-resident
        pl.BlockSpec((HIDDEN, HIDDEN), lambda i: (0, 0)),
        pl.BlockSpec((1, HIDDEN), lambda i: (0, 0)),
        pl.BlockSpec((HIDDEN, OUT_PAD), lambda i: (0, 0)),
        pl.BlockSpec((1, OUT_PAD), lambda i: (0, 0)),
    ]
    out_specs = pl.BlockSpec((tb, OUT_PAD), lambda i: (i, 0))

    out = pl.pallas_call(
        softq_kernel,
        out_shape=jax.ShapeDtypeStruct((Bp, OUT_PAD), jnp.float32),
        grid=grid,
        in_specs=in_specs,
        out_specs=out_specs,
        compiler_params=pltpu.CompilerParams(
            dimension_semantics=("parallel",)),
        cost_estimate=cost,
    )(x_bf16, w1_bf16, b1, w2_bf16, b2, w3_bf16, b3p)

    return out[:B, :ACTION_DIM]


def init_params(key):
    # Deterministic synthetic parameters (same shapes as the PyTorch Linears).
    ks = jax.random.split(key, 6)

    def lin(kw, kb, fan_in, fan_out):
        bound = 1.0 / jnp.sqrt(fan_in)
        w = jax.random.uniform(kw, (fan_in, fan_out), jnp.float32, -bound, bound)
        b = jax.random.uniform(kb, (1, fan_out), jnp.float32, -bound, bound)
        return w, b

    w1, b1 = lin(ks[0], ks[1], OBS_DIM, HIDDEN)
    w2, b2 = lin(ks[2], ks[3], HIDDEN, HIDDEN)
    w3, b3 = lin(ks[4], ks[5], HIDDEN, ACTION_DIM)
    return (w1, b1, w2, b2, w3, b3)


def softq_reference(x, params):
    # Same numerics as the kernel: bf16 MXU inputs, f32 accumulation/epilogue.
    w1, b1, w2, b2, w3, b3 = params
    xb = x.astype(jnp.bfloat16)
    h1 = jnp.dot(xb, w1.astype(jnp.bfloat16),
                 preferred_element_type=jnp.float32) + b1
    h1 = jnp.maximum(h1, 0.0)
    h2 = jnp.dot(h1.astype(jnp.bfloat16), w2.astype(jnp.bfloat16),
                 preferred_element_type=jnp.float32) + b2
    h2 = jnp.maximum(h2, 0.0)
    out = jnp.dot(h2.astype(jnp.bfloat16), w3.astype(jnp.bfloat16),
                  preferred_element_type=jnp.float32) + b3
    if USE_TANH:
        out = jnp.tanh(out) * (1.0 / (1.0 - GAMMA))
    return out


if __name__ == "__main__":
    key = jax.random.PRNGKey(0)
    k_x, k_p = jax.random.split(key)
    x = jax.random.normal(k_x, (BATCH, OBS_DIM), jnp.float32)
    params = init_params(k_p)

    out = softq_forward(x, params)
    jax.block_until_ready(out)

    ref = softq_reference(x, params)
    assert out.shape == (BATCH, ACTION_DIM)
    assert jnp.allclose(out, ref, atol=1e-2, rtol=1e-3), (
        f"max abs err {jnp.max(jnp.abs(out - ref))}")
    print("KERNEL_OK")
</pallas_src>

<mosaic_0001>
module attributes {stable_mosaic.version = 11 : i64} {
  func.func @softq_kernel(%arg0: i32, %arg1: memref<16x16xbf16, #tpu.memory_space<vmem>>, %arg2: memref<16x64xbf16, #tpu.memory_space<vmem>>, %arg3: memref<1x64xf32, #tpu.memory_space<vmem>>, %arg4: memref<64x64xbf16, #tpu.memory_space<vmem>>, %arg5: memref<1x64xf32, #tpu.memory_space<vmem>>, %arg6: memref<64x128xbf16, #tpu.memory_space<vmem>>, %arg7: memref<1x128xf32, #tpu.memory_space<vmem>>, %arg8: memref<16x128xf32, #tpu.memory_space<vmem>>) attributes {dimension_semantics = [#tpu.dimension_semantics<parallel>], iteration_bounds = array<i64: 1>, scalar_prefetch = 0 : i64, scratch_operands = 0 : i64, tpu.core_type = #tpu.core_type<tc>, window_params = [{transform_indices = @transform_0, window_bounds = array<i64: 16, 16>}, {pipeline_mode = #tpu.pipeline_mode<synchronous>, transform_indices = @transform_1, window_bounds = array<i64: 16, 64>}, {pipeline_mode = #tpu.pipeline_mode<synchronous>, transform_indices = @transform_2, window_bounds = array<i64: 1, 64>}, {pipeline_mode = #tpu.pipeline_mode<synchronous>, transform_indices = @transform_3, window_bounds = array<i64: 64, 64>}, {pipeline_mode = #tpu.pipeline_mode<synchronous>, transform_indices = @transform_4, window_bounds = array<i64: 1, 64>}, {pipeline_mode = #tpu.pipeline_mode<synchronous>, transform_indices = @transform_5, window_bounds = array<i64: 64, 128>}, {pipeline_mode = #tpu.pipeline_mode<synchronous>, transform_indices = @transform_6, window_bounds = array<i64: 1, 128>}, {transform_indices = @transform_7, window_bounds = array<i64: 16, 128>}]} {
    %c0 = arith.constant 0 : index
    %c0_0 = arith.constant 0 : index
    %0 = vector.load %arg1[%c0, %c0_0] : memref<16x16xbf16, #tpu.memory_space<vmem>>, vector<16x16xbf16>
    %c0_1 = arith.constant 0 : index
    %c0_2 = arith.constant 0 : index
    %1 = vector.load %arg2[%c0_1, %c0_2] : memref<16x64xbf16, #tpu.memory_space<vmem>>, vector<16x64xbf16>
    %cst = arith.constant dense<0.000000e+00> : vector<16x64xf32>
    %2 = tpu.matmul %0, %1, %cst {dimension_numbers = #tpu.dot_dimension_numbers<[1], [0], [0], [1], [0, 0, 1, 1], [], []>} : vector<16x16xbf16>, vector<16x64xbf16>, vector<16x64xf32> -> vector<16x64xf32>
    %c0_3 = arith.constant 0 : index
    %c0_4 = arith.constant 0 : index
    %3 = vector.load %arg3[%c0_3, %c0_4] : memref<1x64xf32, #tpu.memory_space<vmem>>, vector<1x64xf32>
    %4 = vector.broadcast %3 : vector<1x64xf32> to vector<16x64xf32>
    %5 = arith.addf %2, %4 : vector<16x64xf32>
    %cst_5 = arith.constant 0.000000e+00 : f32
    %6 = vector.broadcast %cst_5 : f32 to vector<16x64xf32>
    %7 = arith.maximumf %5, %6 : vector<16x64xf32>
    %8 = arith.truncf %7 : vector<16x64xf32> to vector<16x64xbf16>
    %c0_6 = arith.constant 0 : index
    %c0_7 = arith.constant 0 : index
    %9 = vector.load %arg4[%c0_6, %c0_7] : memref<64x64xbf16, #tpu.memory_space<vmem>>, vector<64x64xbf16>
    %cst_8 = arith.constant dense<0.000000e+00> : vector<16x64xf32>
    %10 = tpu.matmul %8, %9, %cst_8 {dimension_numbers = #tpu.dot_dimension_numbers<[1], [0], [0], [1], [0, 0, 1, 1], [], []>} : vector<16x64xbf16>, vector<64x64xbf16>, vector<16x64xf32> -> vector<16x64xf32>
    %c0_9 = arith.constant 0 : index
    %c0_10 = arith.constant 0 : index
    %11 = vector.load %arg5[%c0_9, %c0_10] : memref<1x64xf32, #tpu.memory_space<vmem>>, vector<1x64xf32>
    %12 = vector.broadcast %11 : vector<1x64xf32> to vector<16x64xf32>
    %13 = arith.addf %10, %12 : vector<16x64xf32>
    %cst_11 = arith.constant 0.000000e+00 : f32
    %14 = vector.broadcast %cst_11 : f32 to vector<16x64xf32>
    %15 = arith.maximumf %13, %14 : vector<16x64xf32>
    %16 = arith.truncf %15 : vector<16x64xf32> to vector<16x64xbf16>
    %c0_12 = arith.constant 0 : index
    %c0_13 = arith.constant 0 : index
    %17 = vector.load %arg6[%c0_12, %c0_13] : memref<64x128xbf16, #tpu.memory_space<vmem>>, vector<64x128xbf16>
    %cst_14 = arith.constant dense<0.000000e+00> : vector<16x128xf32>
    %18 = tpu.matmul %16, %17, %cst_14 {dimension_numbers = #tpu.dot_dimension_numbers<[1], [0], [0], [1], [0, 0, 1, 1], [], []>} : vector<16x64xbf16>, vector<64x128xbf16>, vector<16x128xf32> -> vector<16x128xf32>
    %c0_15 = arith.constant 0 : index
    %c0_16 = arith.constant 0 : index
    %19 = vector.load %arg7[%c0_15, %c0_16] : memref<1x128xf32, #tpu.memory_space<vmem>>, vector<1x128xf32>
    %20 = vector.broadcast %19 : vector<1x128xf32> to vector<16x128xf32>
    %21 = arith.addf %18, %20 : vector<16x128xf32>
    %22 = math.tanh %21 : vector<16x128xf32>
    %cst_17 = arith.constant 1.000000e+02 : f32
    %23 = vector.broadcast %cst_17 : f32 to vector<16x128xf32>
    %24 = arith.mulf %22, %23 : vector<16x128xf32>
    %c0_18 = arith.constant 0 : index
    %c0_19 = arith.constant 0 : index
    %25 = vector.load %arg8[%c0_18, %c0_19] : memref<16x128xf32, #tpu.memory_space<vmem>>, vector<16x128xf32>
    tpu.vector_store %arg8[%c0_18, %c0_19], %24 {strides = array<i32>} : memref<16x128xf32, #tpu.memory_space<vmem>>, vector<16x128xf32>,
    return
  }
  func.func @transform_0(%arg0: i32) -> (i32, i32) {
    %c0_i32 = arith.constant 0 : i32
    %c0_i32_0 = arith.constant 0 : i32
    return %arg0, %c0_i32 : i32, i32
  }
  func.func @transform_1(%arg0: i32) -> (i32, i32) {
    %c0_i32 = arith.constant 0 : i32
    %c0_i32_0 = arith.constant 0 : i32
    %c0_i32_1 = arith.constant 0 : i32
    return %c0_i32, %c0_i32_0 : i32, i32
  }
  func.func @transform_2(%arg0: i32) -> (i32, i32) {
    %c0_i32 = arith.constant 0 : i32
    %c0_i32_0 = arith.constant 0 : i32
    %c0_i32_1 = arith.constant 0 : i32
    return %c0_i32, %c0_i32_0 : i32, i32
  }
  func.func @transform_3(%arg0: i32) -> (i32, i32) {
    %c0_i32 = arith.constant 0 : i32
    %c0_i32_0 = arith.constant 0 : i32
    %c0_i32_1 = arith.constant 0 : i32
    return %c0_i32, %c0_i32_0 : i32, i32
  }
  func.func @transform_4(%arg0: i32) -> (i32, i32) {
    %c0_i32 = arith.constant 0 : i32
    %c0_i32_0 = arith.constant 0 : i32
    %c0_i32_1 = arith.constant 0 : i32
    return %c0_i32, %c0_i32_0 : i32, i32
  }
  func.func @transform_5(%arg0: i32) -> (i32, i32) {
    %c0_i32 = arith.constant 0 : i32
    %c0_i32_0 = arith.constant 0 : i32
    %c0_i32_1 = arith.constant 0 : i32
    return %c0_i32, %c0_i32_0 : i32, i32
  }
  func.func @transform_6(%arg0: i32) -> (i32, i32) {
    %c0_i32 = arith.constant 0 : i32
    %c0_i32_0 = arith.constant 0 : i32
    %c0_i32_1 = arith.constant 0 : i32
    return %c0_i32, %c0_i32_0 : i32, i32
  }
  func.func @transform_7(%arg0: i32) -> (i32, i32) {
    %c0_i32 = arith.constant 0 : i32
    %c0_i32_0 = arith.constant 0 : i32
    return %arg0, %c0_i32 : i32, i32
  }
}

</mosaic_0001>

<bundles_post_ra>
// kernel: tpu_custom_call.1
= control target key start
LH: loop header
LB: loop body
LE: loop exit
PB: predicated region body
PF: predicated region fallthrough
CT: control target
= control target key end

     0   :  { %12 = vsyncpa [#allocation3], 0  ;;  %s697_s0 = inlined_call_operand.hbm [shape: bf16[16,16], index: 0, kind: input, shape index: {}]   ;;  %s698_s1 = inlined_call_operand.hbm [shape: bf16[16,64], index: 1, kind: input, shape index: {}]   ;;  %s699_s2 = inlined_call_operand.vmem [shape: f32[1,64], index: 2, kind: input, shape index: {}]   ;;  %s700_s3 = inlined_call_operand.hbm [shape: bf16[64,64], index: 3, kind: input, shape index: {}]   ;;  %s701_s4 = inlined_call_operand.vmem [shape: f32[1,64], index: 4, kind: input, shape index: {}]   ;;  %s702_s5 = inlined_call_operand.hbm [shape: bf16[64,128], index: 5, kind: input, shape index: {}]   ;;  %s703_s6 = inlined_call_operand.vmem [shape: f32[1,128], index: 6, kind: input, shape index: {}]   ;;  %s704_s7 = inlined_call_operand.hbm [shape: f32[16,128], index: 7, kind: output, shape index: {}]  }
   0x1   :  { %13 = vsyncpa [#allocation6], 0 }
   0x2   :  { %14 = vsyncpa [#allocation9], 0 }
   0x3   :  { %15 = vsyncpa [#allocation4], 0  ;;  %s549_s24 = smov [#allocation5]   ;;  %s550_s26 = smov [#allocation2]  }
   0x4   :  { %s33_s25 = sshll.u32 %s549_s24, 4  ;;  %s21_s27 = sshll.u32 %s550_s26, 4  ;;  %s34_s25 = int_to_ptr.vmem [resolvable:$true] %s33_s25  ;;  %s600_s27 = int_to_ptr.vmem [resolvable:$true] %s21_s27 }
   0x5   :  { %s431_s30 = scalar_lea.hbm %s698_s1, 128 }
   0x6   :  { %p432_p0 = scmp.ne.s32.totalorder %s698_s1, %s431_s30  ;;  %p435_p1 = scmp.lt.u32.totalorder %s431_s30, %s698_s1 }
   0x8   :  { %p437_p2 = pnand %p435_p1, %p432_p0 }
   0xa   :  { %440 = shalt.err (!%p437_p2)
}
   0xb   :  { %s441_s12 = scalar_lea.vmem %s34_s25, 128  ;;  %p446_p4 = scmp.lt.s32.totalorder %s34_s25, %s34_s25 }
   0xc   :  { %p442_p3 = scmp.ne.s32.totalorder %s34_s25, %s441_s12  ;;  %p447_p5 = scmp.lt.s32.totalorder %s441_s12, %s441_s12 }
   0xe   :  { %p448_p6 = por %p447_p5, %p446_p4 }
  0x10   :  { %p449_p7 = pnand %p448_p6, %p442_p3 }
  0x12   :  { %452 = shalt.err (!%p449_p7)
}
  0x13   :  { %s551_s13 = smov 64   ;;  %s552_s14 = smov 4  }
  0x14   :  { %39 = dma.hbm_to_vmem [thread:$0]  %s698_s1, 128, %s34_s25, [#allocation6], %s551_s13, %s551_s13, %s552_s14  }
  0x15   :  { %s453_s19 = scalar_lea.hbm %s697_s0, 128 }
  0x16   :  { %p454_p8 = scmp.ne.s32.totalorder %s697_s0, %s453_s19  ;;  %p457_p9 = scmp.lt.u32.totalorder %s453_s19, %s697_s0 }
  0x18   :  { %p459_p10 = pnand %p457_p9, %p454_p8 }
  0x1a   :  { %462 = shalt.err (!%p459_p10)
}
  0x1b   :  { %s463_s24 = scalar_lea.vmem %s600_s27, 128  ;;  %p468_p12 = scmp.lt.s32.totalorder %s600_s27, %s600_s27 }
  0x1c   :  { %p464_p11 = scmp.ne.s32.totalorder %s600_s27, %s463_s24  ;;  %p469_p13 = scmp.lt.s32.totalorder %s463_s24, %s463_s24 }
  0x1e   :  { %p470_p0 = por %p469_p13, %p468_p12 }
  0x20   :  { %p471_p1 = pnand %p470_p0, %p464_p11 }
  0x22   :  { %474 = shalt.err (!%p471_p1)
}
  0x23   :  { %27 = dma.hbm_to_vmem [thread:$0]  %s697_s0, 128, %s600_s27, [#allocation3], %s551_s13, %s551_s13, %s552_s14  }
  0x24   :  { %s553_s26 = smov [#allocation7]   ;;  %s554_s29 = smov [#allocation8]  }
  0x25   :  { %s47_s28 = sshll.u32 %s553_s26, 4  ;;  %s61_s30 = sshll.u32 %s554_s29, 4  ;;  %s48_s28 = int_to_ptr.vmem [resolvable:$true] %s47_s28  ;;  %s637_s30 = int_to_ptr.vmem [resolvable:$true] %s61_s30 }
  0x26   :  { %s475_s10 = scalar_lea.hbm %s700_s3, 512 }
  0x27   :  { %p476_p2 = scmp.ne.s32.totalorder %s700_s3, %s475_s10  ;;  %p479_p3 = scmp.lt.u32.totalorder %s475_s10, %s700_s3 }
  0x29   :  { %p481_p4 = pnand %p479_p3, %p476_p2 }
  0x2b   :  { %484 = shalt.err (!%p481_p4)
}
  0x2c   :  { %s485_s0 = scalar_lea.vmem %s48_s28, 512  ;;  %p490_p6 = scmp.lt.s32.totalorder %s48_s28, %s48_s28 }
  0x2d   :  { %p486_p5 = scmp.ne.s32.totalorder %s48_s28, %s485_s0  ;;  %p491_p7 = scmp.lt.s32.totalorder %s485_s0, %s485_s0 }
  0x2f   :  { %p492_p8 = por %p491_p7, %p490_p6 }
  0x31   :  { %p493_p9 = pnand %p492_p8, %p486_p5 }
  0x33   :  { %496 = shalt.err (!%p493_p9)
}
  0x34   :  { %53 = dma.hbm_to_vmem [thread:$0]  %s700_s3, 512, %s48_s28, [#allocation6], %s551_s13, %s551_s13, %s552_s14  }
  0x35   :  { %s497_s20 = scalar_lea.hbm %s702_s5, 512 }
  0x36   :  { %p498_p10 = scmp.ne.s32.totalorder %s702_s5, %s497_s20  ;;  %p501_p11 = scmp.lt.u32.totalorder %s497_s20, %s702_s5 }
  0x38   :  { %p503_p12 = pnand %p501_p11, %p498_p10 }
  0x3a   :  { %506 = shalt.err (!%p503_p12)
}
  0x3b   :  { %s507_s1 = scalar_lea.vmem %s637_s30, 512  ;;  %p512_p0 = scmp.lt.s32.totalorder %s637_s30, %s637_s30 }
  0x3c   :  { %p508_p13 = scmp.ne.s32.totalorder %s637_s30, %s507_s1  ;;  %p513_p1 = scmp.lt.s32.totalorder %s507_s1, %s507_s1 }
  0x3e   :  { %p514_p2 = por %p513_p1, %p512_p0 }
  0x40   :  { %p515_p3 = pnand %p514_p2, %p508_p13 }
  0x42   :  { %518 = shalt.err (!%p515_p3)
}
  0x43   :  { %67 = dma.hbm_to_vmem [thread:$0]  %s702_s5, 512, %s637_s30, [#allocation9], %s551_s13, %s551_s13, %s552_s14  }
  0x44   :  { %541 = dma.done.wait [#allocation3], 128  }
  0x45   :  { %542 = vsyncadd [#allocation3], 4294967168 }
  0x46   :  { %543 = dma.done.wait [#allocation6], 640  }
  0x47   :  { %544 = vsyncadd [#allocation6], 4294966656 }
  0x48   :  { %545 = dma.done.wait [#allocation9], 512  }
  0x49   :  { %546 = vsyncadd [#allocation9], 4294966784  ;;  %v555_v0 = vmov 0.0   ;;  %vm556_vm0 = vmmov 0   ;;  %v417_v1 = vld [vmem:[#allocation5] sm:$0xff]   ;;  %v418_v2 = vld [vmem:[#allocation2] sm:$0xff]  }
  0x4a   :  { %376 = vmatprep.subr.bf16.mxu0 %v555_v0  ;;  %378 = vmatprep.mubr.msk.bf16.mxu0 %vm556_vm0, %v555_v0  ;;  %vm105_vm1 = vcmask 130048   ;;  %v419_v3 = vld [vmem:[#allocation7] sm:$0xff]   ;;  %v420_v4 = vld [vmem:[#allocation7 + $0x8] sm:$0xff]   ;;  %v421_v5 = vld [vmem:[#allocation7 + $0x10] sm:$0xff]   ;;  %vm192_vm2 = vcmask 523264  }
  0x4b   :  { %382 = vmatprep.subr.bf16.mxu1 %v555_v0  ;;  %390 = vmatprep.mubr.msk.bf16.mxu1 %vm556_vm0, %v555_v0  ;;  %v422_v6 = vld [vmem:[#allocation7 + $0x18] sm:$0xff]   ;;  %v423_v7 = vld [vmem:[#allocation8] sm:$0xff]   ;;  %v424_v8 = vld [vmem:[#allocation8 + $0x8] sm:$0xff]  }
  0x4c   :  { %377 = vmatpush3.bf16.msra.mxu0 %v417_v1  ;;  %383 = vmatpush3.bf16.msra.mxu1 %v419_v3  ;;  %v348_v9 = vld [vmem:[%s699_s2] ss:$0 sm:$0xff]  ;;  %v426_v20 = vld [vmem:[#allocation8 + $0x18] sm:$0xff]  }
  0x4d   :  { %394 = vmatprep.subr.bf16.mxu0 %v555_v0  ;;  %384 = vmatprep.subr.bf16.mxu1 %v555_v0  ;;  %v425_v19 = vld [vmem:[#allocation8 + $0x10] sm:$0xff]  }
  0x4e   :  { %v352_v21 = vld [vmem:[%s701_s4] ss:$0 sm:$0xff]  ;;  %s557_s4 = smov [#allocation10]  }
  0x4f   :  { %379 = vmatmul.mubr.msk.bf16.vlgmr.msra.gmra.mrb[0].mxu0 %vm105_vm1, %v418_v2  ;;  %v358_v31 = vld [vmem:[%s703_s6] ss:$0 sm:$0xff]  ;;  %s334_s29 = sshll.u32 %s557_s4, 4  ;;  %s335_s29 = int_to_ptr.vmem [resolvable:$true] %s334_s29 }
  0x50   :  { %402 = vmatprep.mubr.msk.bf16.mxu0 %vm556_vm0, %v555_v0  ;;  %385 = vmatpush3.bf16.msra.mxu1 %v420_v4  ;;  %s519_s30 = scalar_lea.vmem %s335_s29, 256  ;;  %p524_p5 = scmp.lt.s32.totalorder %s335_s29, %s335_s29 }
  0x51   :  { %386 = vmatprep.subr.bf16.mxu1 %v555_v0  ;;  %395 = vmatpush3.bf16.msra.mxu0 %v423_v7  ;;  %p520_p4 = scmp.ne.s32.totalorder %s335_s29, %s519_s30  ;;  %p525_p6 = scmp.lt.s32.totalorder %s519_s30, %s519_s30 }
  0x52   :  { %396 = vmatprep.subr.bf16.mxu0 %v555_v0 }
  0x53   :  { %p526_p7 = por %p525_p6, %p524_p5 }
  0x54   :  { %387 = vmatpush3.bf16.msra.mxu1 %v421_v5 }
  0x55   :  { %388 = vmatprep.subr.bf16.mxu1 %v555_v0  ;;  %397 = vmatpush3.bf16.msra.mxu0 %v424_v8  ;;  %p527_p8 = pnand %p526_p7, %p520_p4 }
  0x56   :  { %398 = vmatprep.subr.bf16.mxu0 %v555_v0 }
  0x58   :  { %389 = vmatpush3.bf16.msra.mxu1 %v422_v6 }
  0x59   :  { %399 = vmatpush3.bf16.msra.mxu0 %v425_v19 }
  0x5a   :  { %400 = vmatprep.subr.bf16.mxu0 %v555_v0 }
  0x5d   :  { %401 = vmatpush3.bf16.msra.mxu0 %v426_v20 }
 0x122   :  { %v143_v10 = vpop.f32.mrb[0].mxu0 }
 0x123   :  { %v144_v11 = vadd.f32 %v348_v9, %v143_v10  ;;  %v380_v12 = vpop.f32.mrb[1].mxu0 }
 0x124   :  { %v146_v13 = vpop.f32.mrb[2].mxu0 }
 0x125   :  { %v147_v14 = vadd.f32 %v348_v9, %v146_v13  ;;  %v381_v15 = vpop.f32.mrb[3].mxu0  ;;  %v150_v16 = vmax.f32 %v144_v11, 0.0 }
 0x127   :  { %v151_v17 = vmax.f32 %v147_v14, 0.0 }
 0x129   :  { %v152_v18 = vpack.c.bf16 %v151_v17, %v150_v16 }
 0x12b   :  { %391 = vmatmul.mubr.msk.bf16.vlgmr.msra.gmra.mrb[0].mxu1 %vm192_vm2, %v152_v18 }
 0x1fe   :  { %v230_v22 = vpop.f32.mrb[0].mxu1 }
 0x1ff   :  { %v231_v23 = vadd.f32 %v352_v21, %v230_v22  ;;  %v392_v24 = vpop.f32.mrb[1].mxu1 }
 0x200   :  { %v233_v25 = vpop.f32.mrb[2].mxu1 }
 0x201   :  { %v234_v26 = vadd.f32 %v352_v21, %v233_v25  ;;  %v393_v27 = vpop.f32.mrb[3].mxu1  ;;  %v237_v28 = vmax.f32 %v231_v23, 0.0 }
 0x203   :  { %v238_v29 = vmax.f32 %v234_v26, 0.0 }
 0x205   :  { %v239_v30 = vpack.c.bf16 %v238_v29, %v237_v28 }
 0x207   :  { %403 = vmatmul.mubr.msk.bf16.vlgmr.msra.gmra.mrb[4].mxu0 %vm192_vm2, %v239_v30 }
 0x2da   :  { %v316_v32 = vpop.f32.mrb[4].mxu0 }
 0x2db   :  { %v317_v33 = vadd.f32 %v358_v31, %v316_v32  ;;  %v404_v34 = vpop.f32.mrb[5].mxu0 }
 0x2dc   :  { %v319_v35 = vpop.f32.mrb[6].mxu0 }
 0x2dd   :  { %427 = vtanh.f32 %v317_v33  ;;  %v320_v36 = vadd.f32 %v358_v31, %v319_v35  ;;  %v405_v37 = vpop.f32.mrb[7].mxu0 }
 0x2df   :  { %429 = vtanh.f32 %v320_v36 }
 0x2e7   :  { %v428_v38 = vpop.eup %427 }
 0x2e8   :  { %v325_v39 = vmul.f32 100.0, %v428_v38 }
 0x2e9   :  { %v430_v40 = vpop.eup %429 }
 0x2ea   :  { %327 = vst [vmem:[#allocation10] sm:$0xff] %v325_v39  ;;  %v326_v41 = vmul.f32 100.0, %v430_v40 }
 0x2ec   :  { %328 = vst [vmem:[#allocation10 + $0x8] sm:$0xff] %v326_v41 }
 0x2ed   :  { %530 = shalt.err (!%p527_p8)
}
 0x2ee   :  { %s531_s9 = scalar_lea.hbm %s704_s7, 256 }
 0x2ef   :  { %p532_p9 = scmp.ne.s32.totalorder %s704_s7, %s531_s9  ;;  %p535_p10 = scmp.lt.u32.totalorder %s531_s9, %s704_s7 }
 0x2f1   :  { %p537_p11 = pnand %p535_p10, %p532_p9 }
 0x2f3   :  { %540 = shalt.err (!%p537_p11)
}
 0x2f4   :  { %s558_s16 = smov 128   ;;  %s559_s0 = smov 8  }
 0x2f5   :  { %340 = dma.vmem_to_hbm [thread:$0]  %s335_s29, 256, %s704_s7, [#allocation4], %s558_s16, %s558_s16, %s559_s0  }
 0x2f6   :  { %547 = dma.done.wait [#allocation4], 256  }
 0x2f7   :  { %548 = vsyncadd [#allocation4], 4294967040 }
 0x2f8   :  { %344 = vsyncpa [#allocation3], 1 }
 0x2f9   :  { %345 = vsyncpa [#allocation6], 1 }
 0x2fa   :  { %346 = vsyncpa [#allocation9], 1 }
 0x2fb   :  { %347 = vsyncpa [#allocation4], 1 }

</bundles_post_ra>
